<compile_context>
chip_gen: v7x
topology: tpu7x:2x2x1
jax: 0.10.0
libtpu: 0.0.40
codegen_flags: <defaults>
</compile_context>

<pallas_src>
import jax
import jax.numpy as jnp
from jax.experimental import pallas as pl
from jax.experimental.pallas import tpu as pltpu


def _pad_kernel(x_ref, o_ref):
    # x_ref: (bn, C, H, W)    o_ref: (bn, C, H+p, W+p)
    h = x_ref.shape[-2]
    w = x_ref.shape[-1]
    hp = o_ref.shape[-2]
    wp = o_ref.shape[-1]

    # Each output element is stored exactly once (no full-tile pre-zero):
    #   1) interior copy
    o_ref[:, :, :h, :w] = x_ref[...]
    #   2) right strip: rows [0, h), cols [w, wp)
    o_ref[:, :, :h, w:] = jnp.zeros(o_ref.shape[:2] + (h, wp - w), o_ref.dtype)
    #   3) bottom strip: rows [h, hp), all cols
    o_ref[:, :, h:, :] = jnp.zeros(o_ref.shape[:2] + (hp - h, wp), o_ref.dtype)


def dynamic_pad_layer(x, stride_product, *, vmem_budget_bytes=8 * 1024 * 1024):
    """JAX/Pallas equivalent of DynamicPadLayer(stride_product)(x); x is NCHW."""
    n, c, h, w = x.shape
    input_size = h                                    # PyTorch uses x.shape[2]
    p = stride_product - input_size % stride_product  # static, trace-time
    hp, wp = h + p, w + p

    # --- choose batch-block size so each grid step moves a large chunk -------
    dtype_bytes = jnp.dtype(x.dtype).itemsize
    bytes_per_batch = (c * h * w + c * hp * wp) * dtype_bytes
    # double-buffered (in + out) per step must fit the (conservative, v7x-safe)
    # VMEM budget; budget kept under the default scoped limit on all gens.
    bn = max(1, min(n, vmem_budget_bytes // max(1, 2 * bytes_per_batch)))
    # keep >=2 grid steps when possible so v7x's 2 TensorCores both get work
    if n >= 2:
        bn = min(bn, pl.cdiv(n, 2))
    # require clean tiling along the batch axis
    while n % bn != 0:
        bn -= 1
    grid = (n // bn,)

    return pl.pallas_call(
        _pad_kernel,
        out_shape=jax.ShapeDtypeStruct((n, c, hp, wp), x.dtype),
        grid=grid,
        in_specs=[
            pl.BlockSpec((bn, c, h, w), lambda i: (i, 0, 0, 0)),
        ],
        out_specs=pl.BlockSpec((bn, c, hp, wp), lambda i: (i, 0, 0, 0)),
        compiler_params=pltpu.CompilerParams(
            dimension_semantics=("parallel",),
        ),
    )(x)


if __name__ == "__main__":
    key = jax.random.PRNGKey(0)
    N, C, H, W = 2, 4, 16, 16
    stride_product = 6  # p = 6 - 16 % 6 = 2  -> output spatial 18x18
    x = jax.random.normal(key, (N, C, H, W), dtype=jnp.float32)

    out = dynamic_pad_layer(x, stride_product)
    out = jax.block_until_ready(out)

    # correctness check against plain-JAX reference
    p = stride_product - H % stride_product
    ref = jnp.pad(x, ((0, 0), (0, 0), (0, p), (0, p)))
    assert out.shape == ref.shape, (out.shape, ref.shape)
    assert jnp.allclose(out, ref), "mismatch vs reference pad"

    print("KERNEL_OK")
</pallas_src>

<mosaic_0001>
module attributes {stable_mosaic.version = 11 : i64} {
  func.func @_pad_kernel(%arg0: i32, %arg1: memref<1x4x16x16xf32, #tpu.memory_space<vmem>>, %arg2: memref<1x4x18x18xf32, #tpu.memory_space<vmem>>) attributes {dimension_semantics = [#tpu.dimension_semantics<parallel>], iteration_bounds = array<i64: 2>, scalar_prefetch = 0 : i64, scratch_operands = 0 : i64, tpu.core_type = #tpu.core_type<tc>, window_params = [{transform_indices = @transform_0, window_bounds = array<i64: 1, 4, 16, 16>}, {transform_indices = @transform_1, window_bounds = array<i64: 1, 4, 18, 18>}]} {
    %c0 = arith.constant 0 : index
    %c0_0 = arith.constant 0 : index
    %c0_1 = arith.constant 0 : index
    %c0_2 = arith.constant 0 : index
    %0 = vector.load %arg1[%c0, %c0_0, %c0_1, %c0_2] : memref<1x4x16x16xf32, #tpu.memory_space<vmem>>, vector<1x4x16x16xf32>
    %c0_3 = arith.constant 0 : index
    %c0_4 = arith.constant 0 : index
    %c0_5 = arith.constant 0 : index
    %c0_6 = arith.constant 0 : index
    %1 = vector.load %arg2[%c0_3, %c0_4, %c0_5, %c0_6] : memref<1x4x18x18xf32, #tpu.memory_space<vmem>>, vector<1x4x16x16xf32>
    tpu.vector_store %arg2[%c0_3, %c0_4, %c0_5, %c0_6], %0 {strides = array<i32>} : memref<1x4x18x18xf32, #tpu.memory_space<vmem>>, vector<1x4x16x16xf32>,
    %cst = arith.constant 0.000000e+00 : f32
    %2 = vector.broadcast %cst : f32 to vector<1x4x16x2xf32>
    %c0_7 = arith.constant 0 : index
    %c0_8 = arith.constant 0 : index
    %c0_9 = arith.constant 0 : index
    %c16 = arith.constant 16 : index
    %3 = vector.load %arg2[%c0_7, %c0_8, %c0_9, %c16] : memref<1x4x18x18xf32, #tpu.memory_space<vmem>>, vector<1x4x16x2xf32>
    tpu.vector_store %arg2[%c0_7, %c0_8, %c0_9, %c16], %2 {strides = array<i32>} : memref<1x4x18x18xf32, #tpu.memory_space<vmem>>, vector<1x4x16x2xf32>,
    %cst_10 = arith.constant 0.000000e+00 : f32
    %4 = vector.broadcast %cst_10 : f32 to vector<1x4x2x18xf32>
    %c0_11 = arith.constant 0 : index
    %c0_12 = arith.constant 0 : index
    %c16_13 = arith.constant 16 : index
    %c0_14 = arith.constant 0 : index
    %5 = vector.load %arg2[%c0_11, %c0_12, %c16_13, %c0_14] : memref<1x4x18x18xf32, #tpu.memory_space<vmem>>, vector<1x4x2x18xf32>
    tpu.vector_store %arg2[%c0_11, %c0_12, %c16_13, %c0_14], %4 {strides = array<i32>} : memref<1x4x18x18xf32, #tpu.memory_space<vmem>>, vector<1x4x2x18xf32>,
    return
  }
  func.func @transform_0(%arg0: i32) -> (i32, i32, i32, i32) {
    %c0_i32 = arith.constant 0 : i32
    %c0_i32_0 = arith.constant 0 : i32
    %c0_i32_1 = arith.constant 0 : i32
    %c0_i32_2 = arith.constant 0 : i32
    return %arg0, %c0_i32, %c0_i32_0, %c0_i32_1 : i32, i32, i32, i32
  }
  func.func @transform_1(%arg0: i32) -> (i32, i32, i32, i32) {
    %c0_i32 = arith.constant 0 : i32
    %c0_i32_0 = arith.constant 0 : i32
    %c0_i32_1 = arith.constant 0 : i32
    %c0_i32_2 = arith.constant 0 : i32
    return %arg0, %c0_i32, %c0_i32_0, %c0_i32_1 : i32, i32, i32, i32
  }
}

</mosaic_0001>

<bundles_post_ra>
// kernel: tpu_custom_call.1
= control target key start
LH: loop header
LB: loop body
LE: loop exit
PB: predicated region body
PF: predicated region fallthrough
CT: control target
= control target key end

     0   :  { %6 = vsyncpa [#allocation3], 0  ;;  %s494_s0 = inlined_call_operand.hbm [shape: f32[2,4,16,16], index: 0, kind: input, shape index: {}]   ;;  %s495_s1 = inlined_call_operand.vmem [shape: f32[2,4,18,18], index: 1, kind: output, shape index: {}]  }
   0x1   :  { %8 = vsyncpa [#allocation3 + $0x1], 0  ;;  %s370_s6 = smov 0   ;;  %s372_s7 = smov 0  }
   0x2   :  { %s374_s8 = smov 0   ;;  %s376_s9 = smov 0  }
   0x3 LB: > { %s389_s10 = sadd.s32 4294967295, %s354_s9   ;;  %s392_s11 = sadd.s32 1, %s354_s9   ;;  %s354_s9 = sphi %s376_s9, %s502_s9   ;;  %s350_s8 = sphi %s374_s8, %s501_s8   ;;  %s346_s7 = sphi %s372_s7, %s500_s7   ;;  %s342_s6 = sphi %s370_s6, %s499_s6  }
   0x4   : > { %s18_s12 = ssub.s32 %s354_s9, %s392_s11  ;;  %s21_s13 = sadd.s32 1, %s350_s8 }
   0x5   : > { %p19_p0 = scmp.eq.s32.totalorder %s18_s12, 0  ;;  %p28_p1 = scmp.ne.s32.totalorder %s350_s8, %s346_s7 }
   0x6   : > { %p29_p2 = scmp.eq.s32.totalorder %s354_s9, 0  ;;  %p34_p3 = scmp.ne.s32.totalorder %s346_s7, %s342_s6 }
   0x7   : > { %s402_s14 = scalar_select %p19_p0, %s350_s8, %s21_s13  }
   0x8   : > { %p30_p4 = por %p29_p2, %p28_p1  ;;  %p35_p5 = scmp.eq.s32.totalorder %s389_s10, 0 }
   0x9   : > { %p254_p6 = scmp.lt.s32.totalorder %s354_s9, 2  ;;  %s84_s16 = sand.u32 1, %s350_s8  }
   0xa   : > { %p406_p7 = por %p35_p5, %p34_p3  ;;  %s238_s17 = sshll.u32 %s84_s16, 6 }
   0xb   : > { %s246_s18 = sshll.u32 %s354_s9, 10  ;;  %s88_s22 = scalar_lea.vmem [#allocation2], %s238_s17 }
   0xc   : > { %s415_s21 = scalar_lea.hbm %s494_s0, %s246_s18  ;;  %s95_s23 = sshll.u32 %s88_s22, 4  ;;  %s417_s23 = int_to_ptr.vmem [resolvable:$true] %s95_s23 }
   0xd   : > { %p419_p8 = pnand %p254_p6, %p30_p4  ;;  %s424_s25 = scalar_lea.sflag [#allocation3], %s84_s16 }
   0xe   : > { %s290_s26 = scalar_lea.hbm %s415_s21, 1024  ;;  %s295_s29 = scalar_lea.hbm %s494_s0, 2048 }
   0xf   : > { %p291_p10 = scmp.ne.s32.totalorder %s415_s21, %s290_s26  ;;  %p292_p11 = pneg %p419_p8 }
  0x10   : > { %p296_p0 = scmp.lt.u32.totalorder %s415_s21, %s494_s0  ;;  %p297_p1 = scmp.lt.u32.totalorder %s295_s29, %s290_s26 }
  0x11   : > { %p293_p12 = pnand %p292_p11, %p291_p10  ;;  %p299_p3 = scmp.lt.u32.totalorder %s290_s26, %s415_s21 }
  0x12   : > { %p298_p2 = por %p297_p1, %p296_p0 }
  0x13   : > { %p294_p13 = pneg %p293_p12 }
  0x14   : > { %p300_p4 = por %p299_p3, %p298_p2 }
  0x16   : > { %p301_p5 = pnand %p300_p4, %p294_p13 }
  0x18   : > { %304 = shalt.err (!%p301_p5)
}
  0x19   : > { %s305_s3 = scalar_lea.vmem %s417_s23, 1024  ;;  %s356_s4 = smov [#allocation2]  }
  0x1a   : > { %p306_p6 = scmp.ne.s32.totalorder %s417_s23, %s305_s3  ;;  %s310_s5 = sshll.u32 %s356_s4, 4  ;;  %s311_s5 = int_to_ptr.vmem [resolvable:$false] %s310_s5 }
  0x1b   : > { %s312_s6 = scalar_lea.vmem %s311_s5, 2048  ;;  %p313_p9 = scmp.lt.s32.totalorder %s417_s23, %s311_s5 }
  0x1c   : > { %p308_p10 = pnand %p306_p6, %p292_p11  ;;  %p314_p0 = scmp.lt.s32.totalorder %s312_s6, %s305_s3 }
  0x1e   : > { %p309_p12 = pneg %p308_p10  ;;  %p315_p1 = por %p314_p0, %p313_p9 }
  0x20   : > { %p316_p2 = pnand %p315_p1, %p309_p12 }
  0x22   : > { %319 = shalt.err (!%p316_p2)
}
  0x23   : > { %s357_s12 = smov 128   ;;  %s358_s13 = smov 8  }
  0x24   : > { %253 = dma.hbm_to_vmem [thread:$0]  (!%p419_p8), %s415_s21, 1024, %s417_s23, %s424_s25, %s357_s12, %s357_s12, %s358_s13  }
  0x25   : > { %p103_p11 = scmp.lt.s32.totalorder %s354_s9, 3  ;;  %p498_p13 = scmp.ge.s32.totalorder %s354_s9, 1 }
  0x27   : > { %p104_p3 = pnand %p498_p13, %p103_p11 }
  0x28   : > { %s109_s16 = sand.u32 (!%p104_p3), 1, %s346_s7  }
  0x29   : > { %107 = sbr.rel (%p104_p3) target bundleno = 65 (0x41), region = 24  ;;  %s242_s17 = sshll.u32 (!%p104_p3), %s109_s16, 6 }
  0x2a   : > { %s110_s18 = scalar_lea.sflag (!%p104_p3), [#allocation3], %s109_s16  ;;  %s113_s19 = scalar_lea.vmem (!%p104_p3), [#allocation2], %s242_s17 }
  0x30   : > { %337 = dma.done.wait (%p406_p7), %s110_s18, 1024  }
  0x31   : > { %339 = vsyncadd (%p406_p7), %s110_s18, 4294966272  ;;  %p132_p9 = scmp.lt.s32.totalorder %s389_s10, 1  ;;  %vm163_vm0 = vcmask 140288   ;;  %vm145_vm1 = vcmask 130048   ;;  %vm154_vm2 = vcmask 146560   ;;  %v137_v0 = vld [vmem:[%s113_s19] sm:$0xff] }
  0x32   : > { %v138_v1 = vld [vmem:[%s113_s19 + $0x8] sm:$0xff]  ;;  %v139_v2 = vld [vmem:[%s113_s19 + $0x10] sm:$0xff]  ;;  %v359_v3 = vmov 0.0   ;;  %v140_v4 = vld [vmem:[%s113_s19 + $0x18] sm:$0xff] }
  0x33   : > { %s504_s10 = smov (!%p132_p9, %s389_s10), 1  ;;  %v141_v5 = vld [vmem:[%s113_s19 + $0x20] sm:$0xff]  ;;  %v142_v6 = vld [vmem:[%s113_s19 + $0x28] sm:$0xff]  ;;  %v143_v7 = vld [vmem:[%s113_s19 + $0x30] sm:$0xff] }
  0x34   : > { %s247_s20 = smul.u32 96, %s504_s10  ;;  %v144_v8 = vld [vmem:[%s113_s19 + $0x38] sm:$0xff] }
  0x36   : > { %s136_s22 = scalar_lea.vmem %s495_s1, %s247_s20 }
  0x37   : > { %164 = vst.msk [vmem:[%s136_s22 + $0x10] sm:$0x3] %vm163_vm0, %v359_v3  ;;  %165 = vst.msk [vmem:[%s136_s22 + $0x28] sm:$0x3] %vm163_vm0, %v359_v3 }
  0x38   : > { %166 = vst.msk [vmem:[%s136_s22 + $0x40] sm:$0x3] %vm163_vm0, %v359_v3  ;;  %167 = vst.msk [vmem:[%s136_s22 + $0x58] sm:$0x3] %vm163_vm0, %v359_v3 }
  0x39   : > { %146 = vst.msk [vmem:[%s136_s22] sm:$0xff] %vm145_vm1, %v137_v0  ;;  %147 = vst.msk [vmem:[%s136_s22 + $0x8] sm:$0xff] %vm145_vm1, %v138_v1 }
  0x3a   : > { %148 = vst.msk [vmem:[%s136_s22 + $0x18] sm:$0xff] %vm145_vm1, %v139_v2  ;;  %149 = vst.msk [vmem:[%s136_s22 + $0x20] sm:$0xff] %vm145_vm1, %v140_v4 }
  0x3b   : > { %150 = vst.msk [vmem:[%s136_s22 + $0x30] sm:$0xff] %vm145_vm1, %v141_v5  ;;  %151 = vst.msk [vmem:[%s136_s22 + $0x38] sm:$0xff] %vm145_vm1, %v142_v6 }
  0x3c   : > { %155 = vst.msk [vmem:[%s136_s22] sm:$0xff] %vm154_vm2, %v359_v3  ;;  %156 = vst.msk [vmem:[%s136_s22 + $0x8] sm:$0xff] %vm154_vm2, %v359_v3 }
  0x3d   : > { %157 = vst.msk [vmem:[%s136_s22 + $0x18] sm:$0xff] %vm154_vm2, %v359_v3  ;;  %158 = vst.msk [vmem:[%s136_s22 + $0x20] sm:$0xff] %vm154_vm2, %v359_v3 }
  0x3e   : > { %152 = vst.msk [vmem:[%s136_s22 + $0x48] sm:$0xff] %vm145_vm1, %v143_v7  ;;  %153 = vst.msk [vmem:[%s136_s22 + $0x50] sm:$0xff] %vm145_vm1, %v144_v8 }
  0x3f   : > { %159 = vst.msk [vmem:[%s136_s22 + $0x30] sm:$0xff] %vm154_vm2, %v359_v3  ;;  %160 = vst.msk [vmem:[%s136_s22 + $0x38] sm:$0xff] %vm154_vm2, %v359_v3 }
  0x40   : > { %161 = vst.msk [vmem:[%s136_s22 + $0x48] sm:$0xff] %vm154_vm2, %v359_v3  ;;  %162 = vst.msk [vmem:[%s136_s22 + $0x50] sm:$0xff] %vm154_vm2, %v359_v3 }
  0x41 PF: > { %p11_p7 = scmp.ge.s32.totalorder %s392_s11, 4   ;;  %s499_s6 = smov %s346_s7 }
  0x42   : > { %s500_s7 = smov %s350_s8  ;;  %s501_s8 = smov %s402_s14 }
  0x43   : > { %s502_s9 = smov %s392_s11  ;;  %13 = sbr.rel (!%p11_p7) target bundleno = 3 (0x3), region = 64 }
  0x4a   :  { %189 = vsyncpa [#allocation3], 1 }
  0x4b   :  { %191 = vsyncpa [#allocation3 + $0x1], 1 }

</bundles_post_ra>
